<compile_context>
chip_gen: v5e
topology: v5e:2x2
jax: 0.10.0
libtpu: 0.0.40
codegen_flags: <defaults>
</compile_context>

<pallas_src>
import math
import functools

import jax
import jax.numpy as jnp
from jax.experimental import pallas as pl
from jax.experimental.pallas import tpu as pltpu


# ---------------------------------------------------------------------------
# Fused kernel: one batch image per program.
#   x_ref    : (Cin,  H*W)   input image, spatial flattened on the lane axis
#   w1_ref   : (Cinit, Cin)  1x1 conv weight with BN1 scale folded in
#   b1_ref   : (Cinit, 1)    folded BN1 bias
#   wd_ref   : (Cinit, 9)    3x3 depthwise taps (BN2 scale folded in)
#   b2_ref   : (Cinit, 1)    folded BN2 bias
#   mask_ref : (9, H*W)      0/1 border-validity mask per tap
#   o_ref    : (2*Cinit, H*W) output: rows [0,Cinit)=x1, [Cinit,2*Cinit)=x2
# ---------------------------------------------------------------------------
def _ghost_fused_kernel(x_ref, w1_ref, b1_ref, wd_ref, b2_ref, mask_ref, o_ref,
                        *, W, use_mxu):
    Cin, HW = x_ref.shape
    Cinit = w1_ref.shape[0]

    x = x_ref[...].astype(jnp.float32)          # (Cin, HW)
    w1 = w1_ref[...].astype(jnp.float32)        # (Cinit, Cin)

    # ---- primary 1x1 conv (+ folded BN1 scale) ----
    if use_mxu:
        acc1 = jnp.dot(w1, x, preferred_element_type=jnp.float32)
    else:
        # Tiny channel counts: Cin broadcast-FMAs on the VPU (skip the MXU).
        acc1 = w1[:, 0:1] * x[0:1, :]
        for ci in range(1, Cin):
            acc1 = acc1 + w1[:, ci:ci + 1] * x[ci:ci + 1, :]
    x1 = jnp.maximum(acc1 + b1_ref[...].astype(jnp.float32), 0.0)   # (Cinit, HW)

    # ---- depthwise 3x3, stride 1, pad 1 (+ folded BN2 scale) ----
    wd = wd_ref[...].astype(jnp.float32)        # (Cinit, 9), hoisted once
    msk = mask_ref[...].astype(jnp.float32)     # (9, HW),    hoisted once
    acc2 = jnp.zeros((Cinit, HW), jnp.float32)
    for ki in range(3):
        for kj in range(3):
            k = ki * 3 + kj
            s = (ki - 1) * W + (kj - 1)         # flattened-source offset
            if s == 0:
                # Center tap: no shift, mask is all ones.
                acc2 = acc2 + x1 * wd[:, k:k + 1]
            else:
                shifted = pltpu.roll(x1, shift=(-s) % HW, axis=1)   # XLU
                acc2 = acc2 + shifted * msk[k:k + 1, :] * wd[:, k:k + 1]
    x2 = jnp.maximum(acc2 + b2_ref[...].astype(jnp.float32), 0.0)

    # ---- concat([x1, x2], dim=channel) written straight to the output ----
    o_ref[0:Cinit, :] = x1.astype(o_ref.dtype)
    o_ref[Cinit:2 * Cinit, :] = x2.astype(o_ref.dtype)


# ---------------------------------------------------------------------------
# Wrapper: NCHW in / NCHW out, matching the PyTorch module.
# ---------------------------------------------------------------------------
def ghost_module_forward(x_nchw, params, oup):
    B, Cin, H, W = x_nchw.shape
    w1 = params["w_primary"]                    # (Cinit, Cin)
    Cinit = w1.shape[0]
    HW = H * W

    # Fold inference-mode BN scale into the conv weights (free, done once).
    w1f = (w1 * params["scale1"][:, None]).astype(jnp.float32)            # (Cinit, Cin)
    b1c = params["bias1"].reshape(Cinit, 1).astype(jnp.float32)
    wdf = (params["w_dw"] * params["scale2"][None, None, :])              # (3, 3, Cinit)
    wdf = wdf.reshape(9, Cinit).T.astype(jnp.float32)                     # (Cinit, 9)
    b2c = params["bias2"].reshape(Cinit, 1).astype(jnp.float32)

    # Static 0/1 border masks for the 9 depthwise taps (replaces jnp.pad and
    # any in-kernel div/mod); constant under jit, fetched into VMEM once.
    hh = jnp.arange(H, dtype=jnp.int32)[:, None]
    ww = jnp.arange(W, dtype=jnp.int32)[None, :]
    masks = []
    for ki in range(3):
        for kj in range(3):
            di, dj = ki - 1, kj - 1
            m = (hh + di >= 0) & (hh + di < H) & (ww + dj >= 0) & (ww + dj < W)
            masks.append(m.reshape(HW))
    border_mask = jnp.stack(masks, axis=0).astype(jnp.float32)            # (9, HW)

    # Free view reshape: flatten spatial onto one lane-dense axis.
    x2d = x_nchw.reshape(B, Cin, HW)

    use_mxu = (Cin >= 64 and Cinit >= 64)
    kernel = functools.partial(_ghost_fused_kernel, W=W, use_mxu=use_mxu)

    itemsize = jnp.dtype(x_nchw.dtype).itemsize
    flops = B * HW * Cinit * (2 * Cin + 27 + 4)
    bytes_accessed = ((x2d.size + B * 2 * Cinit * HW) * itemsize
                      + (w1f.size + b1c.size + wdf.size + b2c.size
                         + border_mask.size) * 4)

    out = pl.pallas_call(
        kernel,
        out_shape=jax.ShapeDtypeStruct((B, 2 * Cinit, HW), x_nchw.dtype),
        grid=(B,),
        in_specs=[
            pl.BlockSpec((None, Cin, HW), lambda b: (b, 0, 0)),   # per-image
            pl.BlockSpec((Cinit, Cin), lambda b: (0, 0)),         # resident
            pl.BlockSpec((Cinit, 1), lambda b: (0, 0)),
            pl.BlockSpec((Cinit, 9), lambda b: (0, 0)),
            pl.BlockSpec((Cinit, 1), lambda b: (0, 0)),
            pl.BlockSpec((9, HW), lambda b: (0, 0)),
        ],
        out_specs=pl.BlockSpec((None, 2 * Cinit, HW), lambda b: (b, 0, 0)),
        compiler_params=pltpu.CompilerParams(
            dimension_semantics=("parallel",)),                   # megacore over B
        cost_estimate=pl.CostEstimate(flops=flops, transcendentals=0,
                                      bytes_accessed=bytes_accessed),
    )(x2d, w1f, b1c, wdf, b2c, border_mask)

    out = out.reshape(B, 2 * Cinit, H, W)
    if 2 * Cinit != oup:
        out = out[:, :oup]     # only needed for odd oup; no-op for ratio=2, even oup
    return out


# ---------------------------------------------------------------------------
# Pure-JAX reference (mirrors the PyTorch module, inference-mode BN).
# ---------------------------------------------------------------------------
def ghost_reference(x_nchw, params, oup):
    w1 = params["w_primary"]                     # (Cinit, Cin)
    s1, b1 = params["scale1"], params["bias1"]
    wd = params["w_dw"]                          # (3, 3, Cinit)
    s2, b2 = params["scale2"], params["bias2"]

    x1 = jnp.einsum("oc,bchw->bohw", w1, x_nchw)
    x1 = jnp.maximum(x1 * s1[None, :, None, None] + b1[None, :, None, None], 0.0)

    B, C, H, W = x1.shape
    xp = jnp.pad(x1, ((0, 0), (0, 0), (1, 1), (1, 1)))
    x2 = jnp.zeros_like(x1)
    for ki in range(3):
        for kj in range(3):
            x2 = x2 + xp[:, :, ki:ki + H, kj:kj + W] * wd[ki, kj][None, :, None, None]
    x2 = jnp.maximum(x2 * s2[None, :, None, None] + b2[None, :, None, None], 0.0)

    return jnp.concatenate([x1, x2], axis=1)[:, :oup]


def make_params(key, inp, oup, ratio=2, dw_size=3, eps=1e-5):
    init_channels = math.ceil(oup / ratio)
    new_channels = init_channels * (ratio - 1)
    # TODO(synk): ratio != 2 (multiple ghost filters per input channel in the
    # grouped conv) is not implemented; GhostNet uses ratio=2 everywhere.
    assert new_channels == init_channels and dw_size == 3

    ks = jax.random.split(key, 8)
    # primary 1x1 conv weight: PyTorch (Cout, Cin, 1, 1) -> (Cout, Cin)
    w_primary = 0.1 * jax.random.normal(ks[0], (init_channels, inp), jnp.float32)
    # depthwise weight: PyTorch (new_ch, 1, 3, 3) -> (3, 3, C)
    w_dw = 0.1 * jax.random.normal(ks[1], (dw_size, dw_size, new_channels), jnp.float32)

    # BN (inference): scale = gamma/sqrt(var+eps), bias = beta - mean*scale
    gamma1 = 1.0 + 0.1 * jax.random.normal(ks[2], (init_channels,), jnp.float32)
    beta1 = 0.1 * jax.random.normal(ks[3], (init_channels,), jnp.float32)
    mean1 = 0.05 * jax.random.normal(ks[4], (init_channels,), jnp.float32)
    var1 = jnp.abs(1.0 + 0.1 * jax.random.normal(ks[5], (init_channels,), jnp.float32))
    scale1 = gamma1 / jnp.sqrt(var1 + eps)
    bias1 = beta1 - mean1 * scale1

    gamma2 = 1.0 + 0.1 * jax.random.normal(ks[6], (new_channels,), jnp.float32)
    beta2 = 0.1 * jax.random.normal(ks[7], (new_channels,), jnp.float32)
    scale2 = gamma2 / jnp.sqrt(jnp.ones((new_channels,), jnp.float32) + eps)
    bias2 = beta2

    return dict(w_primary=w_primary, w_dw=w_dw,
                scale1=scale1, bias1=bias1, scale2=scale2, bias2=bias2)


if __name__ == "__main__":
    B, inp, Hh, Ww = 2, 4, 16, 16
    oup = 8          # init_channels = 4, new_channels = 4

    key = jax.random.PRNGKey(0)
    kx, kp = jax.random.split(key)
    x = jax.random.normal(kx, (B, inp, Hh, Ww), jnp.float32)   # NCHW like PyTorch
    params = make_params(kp, inp, oup)

    fwd = jax.jit(lambda xx: ghost_module_forward(xx, params, oup))
    out = jax.block_until_ready(fwd(x))
    assert out.shape == (B, oup, Hh, Ww), out.shape

    ref = ghost_reference(x, params, oup)
    max_err = float(jnp.max(jnp.abs(out - ref)))
    assert max_err < 1e-3, f"max abs error vs reference: {max_err}"

    print("KERNEL_OK")
</pallas_src>

<mosaic_0001>
module attributes {stable_mosaic.version = 11 : i64} {
  func.func @_ghost_fused_kernel(%arg0: i32, %arg1: memref<1x4x256xf32, #tpu.memory_space<vmem>>, %arg2: memref<4x4xf32, #tpu.memory_space<vmem>>, %arg3: memref<4x1xf32, #tpu.memory_space<vmem>>, %arg4: memref<4x9xf32, #tpu.memory_space<vmem>>, %arg5: memref<4x1xf32, #tpu.memory_space<vmem>>, %arg6: memref<9x256xf32, #tpu.memory_space<vmem>>, %arg7: memref<1x8x256xf32, #tpu.memory_space<vmem>>) attributes {dimension_semantics = [#tpu.dimension_semantics<parallel>], iteration_bounds = array<i64: 2>, scalar_prefetch = 0 : i64, scratch_operands = 0 : i64, tpu.core_type = #tpu.core_type<tc>, window_params = [{transform_indices = @transform_0, window_bounds = array<i64: 1, 4, 256>}, {pipeline_mode = #tpu.pipeline_mode<synchronous>, transform_indices = @transform_1, window_bounds = array<i64: 4, 4>}, {pipeline_mode = #tpu.pipeline_mode<synchronous>, transform_indices = @transform_2, window_bounds = array<i64: 4, 1>}, {pipeline_mode = #tpu.pipeline_mode<synchronous>, transform_indices = @transform_3, window_bounds = array<i64: 4, 9>}, {pipeline_mode = #tpu.pipeline_mode<synchronous>, transform_indices = @transform_4, window_bounds = array<i64: 4, 1>}, {pipeline_mode = #tpu.pipeline_mode<synchronous>, transform_indices = @transform_5, window_bounds = array<i64: 9, 256>}, {transform_indices = @transform_6, window_bounds = array<i64: 1, 8, 256>}]} {
    %c0 = arith.constant 0 : index
    %c0_0 = arith.constant 0 : index
    %c0_1 = arith.constant 0 : index
    %0 = vector.load %arg1[%c0, %c0_0, %c0_1] : memref<1x4x256xf32, #tpu.memory_space<vmem>>, vector<1x4x256xf32>
    %1 = vector.shape_cast %0 : vector<1x4x256xf32> to vector<4x256xf32>
    %c0_2 = arith.constant 0 : index
    %c0_3 = arith.constant 0 : index
    %2 = vector.load %arg2[%c0_2, %c0_3] : memref<4x4xf32, #tpu.memory_space<vmem>>, vector<4x4xf32>
    %3 = vector.extract_strided_slice %2 {offsets = [0, 0], sizes = [4, 1], strides = [1, 1]} : vector<4x4xf32> to vector<4x1xf32>
    %4 = vector.extract_strided_slice %1 {offsets = [0, 0], sizes = [1, 256], strides = [1, 1]} : vector<4x256xf32> to vector<1x256xf32>
    %5 = vector.broadcast %3 : vector<4x1xf32> to vector<4x256xf32>
    %6 = vector.broadcast %4 : vector<1x256xf32> to vector<4x256xf32>
    %7 = arith.mulf %5, %6 : vector<4x256xf32>
    %8 = vector.extract_strided_slice %2 {offsets = [0, 1], sizes = [4, 1], strides = [1, 1]} : vector<4x4xf32> to vector<4x1xf32>
    %9 = vector.extract_strided_slice %1 {offsets = [1, 0], sizes = [1, 256], strides = [1, 1]} : vector<4x256xf32> to vector<1x256xf32>
    %10 = vector.broadcast %8 : vector<4x1xf32> to vector<4x256xf32>
    %11 = vector.broadcast %9 : vector<1x256xf32> to vector<4x256xf32>
    %12 = arith.mulf %10, %11 : vector<4x256xf32>
    %13 = arith.addf %7, %12 : vector<4x256xf32>
    %14 = vector.extract_strided_slice %2 {offsets = [0, 2], sizes = [4, 1], strides = [1, 1]} : vector<4x4xf32> to vector<4x1xf32>
    %15 = vector.extract_strided_slice %1 {offsets = [2, 0], sizes = [1, 256], strides = [1, 1]} : vector<4x256xf32> to vector<1x256xf32>
    %16 = vector.broadcast %14 : vector<4x1xf32> to vector<4x256xf32>
    %17 = vector.broadcast %15 : vector<1x256xf32> to vector<4x256xf32>
    %18 = arith.mulf %16, %17 : vector<4x256xf32>
    %19 = arith.addf %13, %18 : vector<4x256xf32>
    %20 = vector.extract_strided_slice %2 {offsets = [0, 3], sizes = [4, 1], strides = [1, 1]} : vector<4x4xf32> to vector<4x1xf32>
    %21 = vector.extract_strided_slice %1 {offsets = [3, 0], sizes = [1, 256], strides = [1, 1]} : vector<4x256xf32> to vector<1x256xf32>
    %22 = vector.broadcast %20 : vector<4x1xf32> to vector<4x256xf32>
    %23 = vector.broadcast %21 : vector<1x256xf32> to vector<4x256xf32>
    %24 = arith.mulf %22, %23 : vector<4x256xf32>
    %25 = arith.addf %19, %24 : vector<4x256xf32>
    %c0_4 = arith.constant 0 : index
    %c0_5 = arith.constant 0 : index
    %26 = vector.load %arg3[%c0_4, %c0_5] : memref<4x1xf32, #tpu.memory_space<vmem>>, vector<4x1xf32>
    %27 = vector.broadcast %26 : vector<4x1xf32> to vector<4x256xf32>
    %28 = arith.addf %25, %27 : vector<4x256xf32>
    %cst = arith.constant 0.000000e+00 : f32
    %29 = vector.broadcast %cst : f32 to vector<4x256xf32>
    %30 = arith.maximumf %28, %29 : vector<4x256xf32>
    %c0_6 = arith.constant 0 : index
    %c0_7 = arith.constant 0 : index
    %31 = vector.load %arg4[%c0_6, %c0_7] : memref<4x9xf32, #tpu.memory_space<vmem>>, vector<4x9xf32>
    %c0_8 = arith.constant 0 : index
    %c0_9 = arith.constant 0 : index
    %32 = vector.load %arg6[%c0_8, %c0_9] : memref<9x256xf32, #tpu.memory_space<vmem>>, vector<9x256xf32>
    %cst_10 = arith.constant 0.000000e+00 : f32
    %33 = vector.broadcast %cst_10 : f32 to vector<4x256xf32>
    %c17_i32 = arith.constant 17 : i32
    %34 = tpu.dynamic_rotate %30 by %c17_i32 dim 1 : vector<4x256xf32>, i32 -> vector<4x256xf32>
    %35 = vector.extract_strided_slice %32 {offsets = [0, 0], sizes = [1, 256], strides = [1, 1]} : vector<9x256xf32> to vector<1x256xf32>
    %36 = vector.broadcast %35 : vector<1x256xf32> to vector<4x256xf32>
    %37 = arith.mulf %34, %36 : vector<4x256xf32>
    %38 = vector.extract_strided_slice %31 {offsets = [0, 0], sizes = [4, 1], strides = [1, 1]} : vector<4x9xf32> to vector<4x1xf32>
    %39 = vector.broadcast %38 : vector<4x1xf32> to vector<4x256xf32>
    %40 = arith.mulf %37, %39 : vector<4x256xf32>
    %41 = arith.addf %33, %40 : vector<4x256xf32>
    %c16_i32 = arith.constant 16 : i32
    %42 = tpu.dynamic_rotate %30 by %c16_i32 dim 1 : vector<4x256xf32>, i32 -> vector<4x256xf32>
    %43 = vector.extract_strided_slice %32 {offsets = [1, 0], sizes = [1, 256], strides = [1, 1]} : vector<9x256xf32> to vector<1x256xf32>
    %44 = vector.broadcast %43 : vector<1x256xf32> to vector<4x256xf32>
    %45 = arith.mulf %42, %44 : vector<4x256xf32>
    %46 = vector.extract_strided_slice %31 {offsets = [0, 1], sizes = [4, 1], strides = [1, 1]} : vector<4x9xf32> to vector<4x1xf32>
    %47 = vector.broadcast %46 : vector<4x1xf32> to vector<4x256xf32>
    %48 = arith.mulf %45, %47 : vector<4x256xf32>
    %49 = arith.addf %41, %48 : vector<4x256xf32>
    %c15_i32 = arith.constant 15 : i32
    %50 = tpu.dynamic_rotate %30 by %c15_i32 dim 1 : vector<4x256xf32>, i32 -> vector<4x256xf32>
    %51 = vector.extract_strided_slice %32 {offsets = [2, 0], sizes = [1, 256], strides = [1, 1]} : vector<9x256xf32> to vector<1x256xf32>
    %52 = vector.broadcast %51 : vector<1x256xf32> to vector<4x256xf32>
    %53 = arith.mulf %50, %52 : vector<4x256xf32>
    %54 = vector.extract_strided_slice %31 {offsets = [0, 2], sizes = [4, 1], strides = [1, 1]} : vector<4x9xf32> to vector<4x1xf32>
    %55 = vector.broadcast %54 : vector<4x1xf32> to vector<4x256xf32>
    %56 = arith.mulf %53, %55 : vector<4x256xf32>
    %57 = arith.addf %49, %56 : vector<4x256xf32>
    %c1_i32 = arith.constant 1 : i32
    %58 = tpu.dynamic_rotate %30 by %c1_i32 dim 1 : vector<4x256xf32>, i32 -> vector<4x256xf32>
    %59 = vector.extract_strided_slice %32 {offsets = [3, 0], sizes = [1, 256], strides = [1, 1]} : vector<9x256xf32> to vector<1x256xf32>
    %60 = vector.broadcast %59 : vector<1x256xf32> to vector<4x256xf32>
    %61 = arith.mulf %58, %60 : vector<4x256xf32>
    %62 = vector.extract_strided_slice %31 {offsets = [0, 3], sizes = [4, 1], strides = [1, 1]} : vector<4x9xf32> to vector<4x1xf32>
    %63 = vector.broadcast %62 : vector<4x1xf32> to vector<4x256xf32>
    %64 = arith.mulf %61, %63 : vector<4x256xf32>
    %65 = arith.addf %57, %64 : vector<4x256xf32>
    %66 = vector.extract_strided_slice %31 {offsets = [0, 4], sizes = [4, 1], strides = [1, 1]} : vector<4x9xf32> to vector<4x1xf32>
    %67 = vector.broadcast %66 : vector<4x1xf32> to vector<4x256xf32>
    %68 = arith.mulf %30, %67 : vector<4x256xf32>
    %69 = arith.addf %65, %68 : vector<4x256xf32>
    %c255_i32 = arith.constant 255 : i32
    %70 = tpu.dynamic_rotate %30 by %c255_i32 dim 1 : vector<4x256xf32>, i32 -> vector<4x256xf32>
    %71 = vector.extract_strided_slice %32 {offsets = [5, 0], sizes = [1, 256], strides = [1, 1]} : vector<9x256xf32> to vector<1x256xf32>
    %72 = vector.broadcast %71 : vector<1x256xf32> to vector<4x256xf32>
    %73 = arith.mulf %70, %72 : vector<4x256xf32>
    %74 = vector.extract_strided_slice %31 {offsets = [0, 5], sizes = [4, 1], strides = [1, 1]} : vector<4x9xf32> to vector<4x1xf32>
    %75 = vector.broadcast %74 : vector<4x1xf32> to vector<4x256xf32>
    %76 = arith.mulf %73, %75 : vector<4x256xf32>
    %77 = arith.addf %69, %76 : vector<4x256xf32>
    %c241_i32 = arith.constant 241 : i32
    %78 = tpu.dynamic_rotate %30 by %c241_i32 dim 1 : vector<4x256xf32>, i32 -> vector<4x256xf32>
    %79 = vector.extract_strided_slice %32 {offsets = [6, 0], sizes = [1, 256], strides = [1, 1]} : vector<9x256xf32> to vector<1x256xf32>
    %80 = vector.broadcast %79 : vector<1x256xf32> to vector<4x256xf32>
    %81 = arith.mulf %78, %80 : vector<4x256xf32>
    %82 = vector.extract_strided_slice %31 {offsets = [0, 6], sizes = [4, 1], strides = [1, 1]} : vector<4x9xf32> to vector<4x1xf32>
    %83 = vector.broadcast %82 : vector<4x1xf32> to vector<4x256xf32>
    %84 = arith.mulf %81, %83 : vector<4x256xf32>
    %85 = arith.addf %77, %84 : vector<4x256xf32>
    %c240_i32 = arith.constant 240 : i32
    %86 = tpu.dynamic_rotate %30 by %c240_i32 dim 1 : vector<4x256xf32>, i32 -> vector<4x256xf32>
    %87 = vector.extract_strided_slice %32 {offsets = [7, 0], sizes = [1, 256], strides = [1, 1]} : vector<9x256xf32> to vector<1x256xf32>
    %88 = vector.broadcast %87 : vector<1x256xf32> to vector<4x256xf32>
    %89 = arith.mulf %86, %88 : vector<4x256xf32>
    %90 = vector.extract_strided_slice %31 {offsets = [0, 7], sizes = [4, 1], strides = [1, 1]} : vector<4x9xf32> to vector<4x1xf32>
    %91 = vector.broadcast %90 : vector<4x1xf32> to vector<4x256xf32>
    %92 = arith.mulf %89, %91 : vector<4x256xf32>
    %93 = arith.addf %85, %92 : vector<4x256xf32>
    %c239_i32 = arith.constant 239 : i32
    %94 = tpu.dynamic_rotate %30 by %c239_i32 dim 1 : vector<4x256xf32>, i32 -> vector<4x256xf32>
    %95 = vector.extract_strided_slice %32 {offsets = [8, 0], sizes = [1, 256], strides = [1, 1]} : vector<9x256xf32> to vector<1x256xf32>
    %96 = vector.broadcast %95 : vector<1x256xf32> to vector<4x256xf32>
    %97 = arith.mulf %94, %96 : vector<4x256xf32>
    %98 = vector.extract_strided_slice %31 {offsets = [0, 8], sizes = [4, 1], strides = [1, 1]} : vector<4x9xf32> to vector<4x1xf32>
    %99 = vector.broadcast %98 : vector<4x1xf32> to vector<4x256xf32>
    %100 = arith.mulf %97, %99 : vector<4x256xf32>
    %101 = arith.addf %93, %100 : vector<4x256xf32>
    %c0_11 = arith.constant 0 : index
    %c0_12 = arith.constant 0 : index
    %102 = vector.load %arg5[%c0_11, %c0_12] : memref<4x1xf32, #tpu.memory_space<vmem>>, vector<4x1xf32>
    %103 = vector.broadcast %102 : vector<4x1xf32> to vector<4x256xf32>
    %104 = arith.addf %101, %103 : vector<4x256xf32>
    %cst_13 = arith.constant 0.000000e+00 : f32
    %105 = vector.broadcast %cst_13 : f32 to vector<4x256xf32>
    %106 = arith.maximumf %104, %105 : vector<4x256xf32>
    %c0_14 = arith.constant 0 : index
    %c0_15 = arith.constant 0 : index
    %c0_16 = arith.constant 0 : index
    %107 = vector.load %arg7[%c0_14, %c0_15, %c0_16] : memref<1x8x256xf32, #tpu.memory_space<vmem>>, vector<1x4x256xf32>
    %108 = vector.shape_cast %107 : vector<1x4x256xf32> to vector<4x256xf32>
    %109 = vector.shape_cast %30 : vector<4x256xf32> to vector<1x4x256xf32>
    tpu.vector_store %arg7[%c0_14, %c0_15, %c0_16], %109 {strides = array<i32>} : memref<1x8x256xf32, #tpu.memory_space<vmem>>, vector<1x4x256xf32>,
    %c0_17 = arith.constant 0 : index
    %c4 = arith.constant 4 : index
    %c0_18 = arith.constant 0 : index
    %110 = vector.load %arg7[%c0_17, %c4, %c0_18] : memref<1x8x256xf32, #tpu.memory_space<vmem>>, vector<1x4x256xf32>
    %111 = vector.shape_cast %110 : vector<1x4x256xf32> to vector<4x256xf32>
    %112 = vector.shape_cast %106 : vector<4x256xf32> to vector<1x4x256xf32>
    tpu.vector_store %arg7[%c0_17, %c4, %c0_18], %112 {strides = array<i32>} : memref<1x8x256xf32, #tpu.memory_space<vmem>>, vector<1x4x256xf32>,
    return
  }
  func.func @transform_0(%arg0: i32) -> (i32, i32, i32) {
    %c0_i32 = arith.constant 0 : i32
    %c0_i32_0 = arith.constant 0 : i32
    %c0_i32_1 = arith.constant 0 : i32
    return %arg0, %c0_i32, %c0_i32_0 : i32, i32, i32
  }
  func.func @transform_1(%arg0: i32) -> (i32, i32) {
    %c0_i32 = arith.constant 0 : i32
    %c0_i32_0 = arith.constant 0 : i32
    %c0_i32_1 = arith.constant 0 : i32
    return %c0_i32, %c0_i32_0 : i32, i32
  }
  func.func @transform_2(%arg0: i32) -> (i32, i32) {
    %c0_i32 = arith.constant 0 : i32
    %c0_i32_0 = arith.constant 0 : i32
    %c0_i32_1 = arith.constant 0 : i32
    return %c0_i32, %c0_i32_0 : i32, i32
  }
  func.func @transform_3(%arg0: i32) -> (i32, i32) {
    %c0_i32 = arith.constant 0 : i32
    %c0_i32_0 = arith.constant 0 : i32
    %c0_i32_1 = arith.constant 0 : i32
    return %c0_i32, %c0_i32_0 : i32, i32
  }
  func.func @transform_4(%arg0: i32) -> (i32, i32) {
    %c0_i32 = arith.constant 0 : i32
    %c0_i32_0 = arith.constant 0 : i32
    %c0_i32_1 = arith.constant 0 : i32
    return %c0_i32, %c0_i32_0 : i32, i32
  }
  func.func @transform_5(%arg0: i32) -> (i32, i32) {
    %c0_i32 = arith.constant 0 : i32
    %c0_i32_0 = arith.constant 0 : i32
    %c0_i32_1 = arith.constant 0 : i32
    return %c0_i32, %c0_i32_0 : i32, i32
  }
  func.func @transform_6(%arg0: i32) -> (i32, i32, i32) {
    %c0_i32 = arith.constant 0 : i32
    %c0_i32_0 = arith.constant 0 : i32
    %c0_i32_1 = arith.constant 0 : i32
    return %arg0, %c0_i32, %c0_i32_0 : i32, i32, i32
  }
}

</mosaic_0001>

<bundles_post_ra>
// kernel: _lambda_.1
= control target key start
LH: loop header
LB: loop body
LE: loop exit
PB: predicated region body
PF: predicated region fallthrough
CT: control target
= control target key end

     0   :  { %s677_s21 = smov 0   ;;  %s814_s0 = inlined_call_operand.vmem [shape: f32[2,4,256], index: 0, kind: input, shape index: {}]   ;;  %s815_s1 = inlined_call_operand.vmem [shape: f32[4,4], index: 1, kind: input, shape index: {}]   ;;  %s816_s2 = inlined_call_operand.vmem [shape: f32[4,1], index: 2, kind: input, shape index: {}]   ;;  %s817_s3 = inlined_call_operand.vmem [shape: f32[4,9], index: 3, kind: input, shape index: {}]   ;;  %s818_s4 = inlined_call_operand.vmem [shape: f32[4,1], index: 4, kind: input, shape index: {}]   ;;  %s819_s5 = inlined_call_operand.vmem [shape: f32[9,256], index: 5, kind: input, shape index: {}]   ;;  %s820_s6 = inlined_call_operand.vmem [shape: f32[2,8,256], index: 6, kind: output, shape index: {}]  }
   0x1 LB: > { %s563_s22 = sadd.s32 4294967295, %s623_s21   ;;  %p567_p0 = scmp.ge.s32.totalorder %s623_s21, 1  ;;  %s623_s21 = sphi %s677_s21, %s16_s21  }
   0x2   : > { %p212_p1 = scmp.lt.s32.totalorder %s623_s21, 3 }
   0x4   : > { %p213_p2 = pnand %p567_p0, %p212_p1 }
   0x5   : > { %p242_p3 = scmp.lt.s32.totalorder (!%p213_p2), %s563_s22, 1  ;;  %s632_s13 = smov (!%p213_p2), 17  }
   0x6   : > { %216 = sbr.rel (%p213_p2) target bundleno = 342 (0x156), region = 44  ;;  %s633_s14 = smov (!%p213_p2), 16  }
   0x7   : > { %s634_s15 = smov (!%p213_p2), 15   ;;  %s635_s16 = smov (!%p213_p2), 127  }
   0x8   : > { %s636_s17 = smov (!%p213_p2), 1   ;;  %s637_s18 = smov (!%p213_p2), 113  }
   0x9   : > { %s638_s19 = smov (!%p213_p2), 112   ;;  %s640_s20 = smov (!%p213_p2), 111  }
   0xb   : > { %v253_v0 = vld [vmem:[%s815_s1] sm:$0xf]  ;;  %v625_v1 = vmov 0   ;;  %v626_v2 = vmov 2   ;;  %v627_v4 = vmov 1   ;;  %v628_v5 = vmov 3  }
   0xc   : > { %601 = vset.pattern.permute.xlu0 %v625_v1  ;;  %603 = vset.pattern.permute.xlu1 %v626_v2  ;;  %v310_v3 = vld [vmem:[%s816_s2] sm:$0xf]  ;;  %v629_v7 = vmov 4   ;;  %s822_s22 = smov (!%p242_p3, %s563_s22), 1  ;;  %v630_v27 = vmov 6   ;;  %v631_v28 = vmov 5  }
   0xd   : > { %256 = vperm.xlu0 %601, %v253_v0   ;;  %283 = vperm.xlu1 %603, %v253_v0   ;;  %v696_v6 = vld [vmem:[%s817_s3] sm:$0xf]  ;;  %s574_s29 = sshll.u32 %s822_s22, 3  ;;  %s575_s9 = sshll.u32 %s822_s22, 4  ;;  %v639_v50 = vmov 8   ;;  %v641_v51 = vmov 7  }
   0xe   : > { %605 = vset.pattern.permute.xlu2 %v625_v1  ;;  %s246_s8 = scalar_lea.vmem %s814_s0, %s574_s29  ;;  %s717_s12 = scalar_lea.vmem %s820_s6, %s575_s9  ;;  %v488_v52 = vld [vmem:[%s818_s4] sm:$0xf] }
   0xf   : > { %313 = vperm.xlu2 %605, %v310_v3   ;;  %v252_v8 = vld [vmem:[%s246_s8] sm:$0xff] }
  0x10   : > { %v260_v11 = vperm.slane %v252_v8, 0  ;;  %v261_v12 = vperm.slane %v252_v8, 4  ;;  %v272_v13 = vperm.slane %v252_v8, 1  ;;  %v273_v14 = vperm.slane %v252_v8, 5 }
  0x11   : > { %v286_v15 = vperm.slane %v252_v8, 2  ;;  %v287_v16 = vperm.slane %v252_v8, 6  ;;  %v300_v17 = vperm.slane %v252_v8, 3  ;;  %v301_v18 = vperm.slane %v252_v8, 7  ;;  %v767_v8 = vld [vmem:[%s819_s5 + $0x8] sm:$0xff] }
  0x12   : > { %v264_v19 = vperm.slane %v260_v11, 0  ;;  %v265_v20 = vperm.slane %v261_v12, 0  ;;  %v276_v21 = vperm.slane %v272_v13, 1  ;;  %v277_v22 = vperm.slane %v273_v14, 1 }
  0x13   : > { %v290_v23 = vperm.slane %v286_v15, 2  ;;  %v291_v24 = vperm.slane %v287_v16, 2  ;;  %v304_v25 = vperm.slane %v300_v17, 3  ;;  %v305_v26 = vperm.slane %v301_v18, 3 }
  0x14   : > { %v355_v12 = vperm.slane %v767_v8, 1  ;;  %v335_v13 = vperm.slane %v767_v8, 0 }
  0x15   : > { %602 = vset.pattern.permute.xlu0 %v627_v4  ;;  %604 = vset.pattern.permute.xlu1 %v628_v5 }
  0x16   : > { %269 = vperm.xlu0 %602, %v253_v0   ;;  %297 = vperm.xlu1 %604, %v253_v0  }
  0x17   : > { %340 = vperm.xlu2 %605, %v696_v6  }
  0x1e   : > { %609 = vset.pattern.permute.xlu0 %v629_v7  ;;  %611 = vset.pattern.permute.xlu1 %v630_v27  ;;  %v762_v7 = vld [vmem:[%s819_s5] sm:$0xff] }
  0x1f   : > { %405 = vperm.xlu0 %609, %v696_v6   ;;  %606 = vset.pattern.permute.xlu2 %v627_v4  ;;  %v354_v11 = vperm.slane %v762_v7, 1  ;;  %v373_v16 = vperm.slane %v762_v7, 2 }
  0x20   : > { %359 = vperm.xlu2 %606, %v696_v6  }
  0x27   : > { %610 = vset.pattern.permute.xlu0 %v631_v28 }
  0x28   : > { %607 = vset.pattern.permute.xlu2 %v626_v2  ;;  %v329_v2 = vlaneseq }
  0x29   : > { %378 = vperm.xlu2 %607, %v696_v6  }
  0x31   : > { %608 = vset.pattern.permute.xlu2 %v628_v5  ;;  %v757_v5 = vand.u32 127, %v329_v2 }
  0x32   : > { %397 = vperm.xlu2 %608, %v696_v6  }
  0x33   : > { %vm351_vm0 = vcmp.lt.s32.totalorder %v757_v5, 16  ;;  %vm331_vm1 = vcmp.lt.s32.totalorder %v757_v5, 17  ;;  %vm370_vm2 = vcmp.lt.s32.totalorder %v757_v5, 15  ;;  %vm389_vm3 = vcmp.lt.s32.totalorder %v757_v5, 1 }
  0x34   : > { %vm416_vm4 = vcmp.lt.s32.totalorder %v757_v5, 127  ;;  %vm435_vm5 = vcmp.lt.s32.totalorder %v757_v5, 113  ;;  %vm473_vm6 = vcmp.lt.s32.totalorder %v757_v5, 111  ;;  %vm454_vm7 = vcmp.lt.s32.totalorder %v757_v5, 112 }
  0x3a   : > { %613 = vset.pattern.permute.xlu2 %v639_v50  ;;  %v439_v50 = vperm.slane %v767_v8, 6 }
  0x69   : > { %v314_v45 = vpop.permute.xlu2 %313 }
  0x71   : > { %v341_v53 = vpop.permute.xlu2 %340 }
  0x7a   : > { %v360_v54 = vpop.permute.xlu2 %359 }
  0x7f   : > { %v257_v9 = vpop.permute.xlu0 %256  ;;  %v284_v10 = vpop.permute.xlu1 %283 }
  0x80   : > { %v266_v31 = vmul.f32 %v264_v19, %v257_v9  ;;  %v267_v32 = vmul.f32 %v265_v20, %v257_v9  ;;  %v292_v35 = vmul.f32 %v290_v23, %v284_v10  ;;  %v293_v36 = vmul.f32 %v291_v24, %v284_v10 }
  0x81   : > { %v334_v10 = vperm.slane %v762_v7, 0  ;;  %v374_v19 = vperm.slane %v767_v8, 2 }
  0x83   : > { %v379_v55 = vpop.permute.xlu2 %378 }
  0x88   : > { %v270_v29 = vpop.permute.xlu0 %269  ;;  %v298_v30 = vpop.permute.xlu1 %297 }
  0x89   : > { %v278_v33 = vmul.f32 %v276_v21, %v270_v29  ;;  %v279_v34 = vmul.f32 %v277_v22, %v270_v29  ;;  %v306_v39 = vmul.f32 %v304_v25, %v298_v30  ;;  %v307_v40 = vmul.f32 %v305_v26, %v298_v30 }
  0x8a   : > { %v392_v25 = vperm.slane %v762_v7, 3  ;;  %v393_v26 = vperm.slane %v767_v8, 3 }
  0x8b   : > { %v280_v37 = vadd.f32 %v278_v33, %v266_v31  ;;  %v281_v38 = vadd.f32 %v279_v34, %v267_v32 }
  0x8c   : > { %v751_v57 = vpop.permute.xlu2 %397 }
  0x8d   : > { %v294_v41 = vadd.f32 %v292_v35, %v280_v37  ;;  %v295_v42 = vadd.f32 %v293_v36, %v281_v38 }
  0x8f   : > { %v308_v43 = vadd.f32 %v306_v39, %v294_v41  ;;  %v309_v44 = vadd.f32 %v307_v40, %v295_v42  ;;  %v419_v41 = vperm.slane %v762_v7, 5 }
  0x91   : > { %v316_v46 = vadd.f32 %v314_v45, %v308_v43  ;;  %v317_v47 = vadd.f32 %v314_v45, %v309_v44  ;;  %v753_v58 = vpop.permute.xlu0 %405  ;;  %v420_v44 = vperm.slane %v767_v8, 5 }
  0x93   : > { %v719_v48 = vmax.f32 %v316_v46, 0.0  ;;  %v721_v49 = vmax.f32 %v317_v47, 0.0  ;;  %v438_v47 = vperm.slane %v762_v7, 6 }
  0x95   : > { %327 = vrot.lane.b32.xlu1 %v721_v49, %s632_s13  ;;  %347 = vrot.lane.b32.xlu0 %v719_v48, %s633_s14  ;;  %499 = vst [vmem:[%s717_s12 + $0x8] sm:$0xf] %v721_v49 }
  0x96   : > { %325 = vrot.lane.b32.xlu2 %v719_v48, %s632_s13  ;;  %498 = vst [vmem:[%s717_s12] sm:$0xf] %v719_v48 }
  0x9d   : > { %349 = vrot.lane.b32.xlu1 %v721_v49, %s633_s14  ;;  %366 = vrot.lane.b32.xlu0 %v719_v48, %s634_s15 }
  0x9e   : > { %414 = vrot.lane.b32.xlu2 %v721_v49, %s635_s16 }
  0xa5   : > { %368 = vrot.lane.b32.xlu1 %v721_v49, %s634_s15  ;;  %385 = vrot.lane.b32.xlu0 %v719_v48, %s636_s17 }
  0xa6   : > { %433 = vrot.lane.b32.xlu2 %v721_v49, %s637_s18 }
  0xad   : > { %443 = vperm.xlu1 %611, %v696_v6   ;;  %424 = vperm.xlu0 %610, %v696_v6  }
  0xae   : > { %452 = vrot.lane.b32.xlu2 %v721_v49, %s638_s19 }
  0xb5   : > { %387 = vrot.lane.b32.xlu1 %v721_v49, %s636_s17  ;;  %471 = vrot.lane.b32.xlu0 %v721_v49, %s640_s20 }
  0xb6   : > { %469 = vrot.lane.b32.xlu2 %v719_v48, %s640_s20  ;;  %612 = vset.pattern.permute.xlu1 %v641_v51 }
  0xb7   : > { %614 = vset.pattern.permute.xlu0 %v625_v1 }
  0xbd   : > { %412 = vrot.lane.b32.xlu1 %v719_v48, %s635_s16  ;;  %491 = vperm.xlu0 %614, %v488_v52  }
  0xbe   : > { %481 = vperm.xlu2 %613, %v696_v6  }
  0xc5   : > { %431 = vrot.lane.b32.xlu1 %v719_v48, %s637_s18 }
  0xcd   : > { %450 = vrot.lane.b32.xlu1 %v719_v48, %s638_s19 }
  0xd5   : > { %462 = vperm.xlu1 %612, %v696_v6  }
  0xf0   : > { %v326_v60 = vpop.permute.xlu2 %325 }
  0xf8   : > { %v415_v0 = vpop.permute.xlu2 %414 }
 0x100   : > { %v434_v4 = vpop.permute.xlu2 %433 }
 0x107   : > { %v328_v56 = vpop.permute.xlu1 %327  ;;  %v348_v61 = vpop.permute.xlu0 %347 }
 0x108   : > { %v332_v17 = vsel %vm331_vm1, %v326_v60, %v328_v56  ;;  %v333_v18 = vsel %vm331_vm1, %v328_v56, %v326_v60  ;;  %v453_v22 = vpop.permute.xlu2 %452 }
 0x109   : > { %v336_v27 = vmul.f32 %v334_v10, %v333_v18  ;;  %v337_v28 = vmul.f32 %v335_v13, %v332_v17  ;;  %v457_v13 = vperm.slane %v762_v7, 7 }
 0x10b   : > { %v343_v39 = vmul.f32 %v341_v53, %v336_v27  ;;  %v344_v40 = vmul.f32 %v341_v53, %v337_v28 }
 0x10f   : > { %v350_v59 = vpop.permute.xlu1 %349  ;;  %v367_v1 = vpop.permute.xlu0 %366 }
 0x110   : > { %v352_v14 = vsel %vm351_vm0, %v348_v61, %v350_v59  ;;  %v353_v15 = vsel %vm351_vm0, %v350_v59, %v348_v61  ;;  %v470_v60 = vpop.permute.xlu2 %469 }
 0x111   : > { %v356_v23 = vmul.f32 %v354_v11, %v353_v15  ;;  %v357_v24 = vmul.f32 %v355_v12, %v352_v14  ;;  %v615_v11 = vld [vmem:[%s819_s5 + $0x10] ss:$0 sm:$0xff]  ;;  %v616_v12 = vld [vmem:[%s819_s5 + $0x18] ss:$0 sm:$0xff]  ;;  %v458_v14 = vperm.slane %v767_v8, 7 }
 0x113   : > { %v362_v35 = vmul.f32 %v360_v54, %v356_v23  ;;  %v363_v36 = vmul.f32 %v360_v54, %v357_v24 }
 0x115   : > { %v364_v51 = vadd.f32 %v362_v35, %v343_v39  ;;  %v365_v52 = vadd.f32 %v363_v36, %v344_v40 }
 0x117   : > { %v369_v62 = vpop.permute.xlu1 %368  ;;  %v386_v6 = vpop.permute.xlu0 %385 }
 0x118   : > { %v371_v20 = vsel %vm370_vm2, %v367_v1, %v369_v62  ;;  %v372_v21 = vsel %vm370_vm2, %v369_v62, %v367_v1  ;;  %v482_v27 = vpop.permute.xlu2 %481 }
 0x119   : > { %v375_v32 = vmul.f32 %v373_v16, %v372_v21  ;;  %v376_v33 = vmul.f32 %v374_v19, %v371_v20 }
 0x11b   : > { %v381_v42 = vmul.f32 %v379_v55, %v375_v32  ;;  %v382_v43 = vmul.f32 %v379_v55, %v376_v33 }
 0x11d   : > { %v383_v55 = vadd.f32 %v381_v42, %v364_v51  ;;  %v384_v61 = vadd.f32 %v382_v43, %v365_v52 }
 0x11f   : > { %v755_v63 = vpop.permute.xlu1 %443  ;;  %v425_v29 = vpop.permute.xlu0 %424 }
 0x127   : > { %v388_v3 = vpop.permute.xlu1 %387 }
 0x128   : > { %v390_v30 = vsel %vm389_vm3, %v386_v6, %v388_v3  ;;  %v391_v31 = vsel %vm389_vm3, %v388_v3, %v386_v6 }
 0x129   : > { %v394_v37 = vmul.f32 %v392_v25, %v391_v31  ;;  %v395_v38 = vmul.f32 %v393_v26, %v390_v30 }
 0x12b   : > { %v400_v54 = vmul.f32 %v751_v57, %v394_v37  ;;  %v401_v53 = vmul.f32 %v751_v57, %v395_v38  ;;  %v408_v57 = vmul.f32 %v753_v58, %v719_v48 }
 0x12d   : > { %v402_v3 = vadd.f32 %v400_v54, %v383_v55  ;;  %v403_v6 = vadd.f32 %v401_v53, %v384_v61 }
 0x12f   : > { %v413_v9 = vpop.permute.xlu1 %412  ;;  %v410_v20 = vadd.f32 %v408_v57, %v402_v3 }
 0x130   : > { %v417_v45 = vsel %vm416_vm4, %v413_v9, %v415_v0  ;;  %v418_v46 = vsel %vm416_vm4, %v415_v0, %v413_v9  ;;  %v472_v0 = vpop.permute.xlu0 %471 }
 0x131   : > { %v421_v62 = vmul.f32 %v419_v41, %v417_v45  ;;  %v422_v1 = vmul.f32 %v420_v44, %v418_v46  ;;  %v474_v15 = vsel %vm473_vm6, %v470_v60, %v472_v0  ;;  %v475_v16 = vsel %vm473_vm6, %v472_v0, %v470_v60 }
 0x132   : > { %v478_v23 = vmul.f32 %v615_v11, %v474_v15  ;;  %v479_v7 = vmul.f32 %v616_v12, %v475_v16 }
 0x133   : > { %v427_v17 = vmul.f32 %v425_v29, %v421_v62  ;;  %v428_v18 = vmul.f32 %v425_v29, %v422_v1 }
 0x134   : > { %v485_v32 = vmul.f32 %v482_v27, %v479_v7 }
 0x135   : > { %v429_v24 = vadd.f32 %v427_v17, %v410_v20 }
 0x137   : > { %v432_v34 = vpop.permute.xlu1 %431 }
 0x138   : > { %v436_v56 = vsel %vm435_vm5, %v432_v34, %v434_v4  ;;  %v437_v59 = vsel %vm435_vm5, %v434_v4, %v432_v34  ;;  %v409_v4 = vmul.f32 %v753_v58, %v721_v49  ;;  %v492_v34 = vpop.permute.xlu0 %491 }
 0x139   : > { %v440_v9 = vmul.f32 %v438_v47, %v436_v56  ;;  %v441_v10 = vmul.f32 %v439_v50, %v437_v59 }
 0x13a   : > { %v411_v21 = vadd.f32 %v409_v4, %v403_v6 }
 0x13b   : > { %v446_v58 = vmul.f32 %v755_v63, %v440_v9  ;;  %v447_v19 = vmul.f32 %v755_v63, %v441_v10 }
 0x13c   : > { %v430_v8 = vadd.f32 %v428_v18, %v411_v21 }
 0x13d   : > { %v448_v29 = vadd.f32 %v446_v58, %v429_v24 }
 0x13e   : > { %v449_v30 = vadd.f32 %v447_v19, %v430_v8 }
 0x13f   : > { %v451_v2 = vpop.permute.xlu1 %450 }
 0x140   : > { %v455_v48 = vsel %vm454_vm7, %v451_v2, %v453_v22  ;;  %v456_v49 = vsel %vm454_vm7, %v453_v22, %v451_v2  ;;  %v484_v22 = vmul.f32 %v482_v27, %v478_v23 }
 0x141   : > { %v459_v25 = vmul.f32 %v457_v13, %v455_v48  ;;  %v460_v26 = vmul.f32 %v458_v14, %v456_v49 }
 0x147   : > { %v463_v28 = vpop.permute.xlu1 %462 }
 0x148   : > { %v465_v31 = vmul.f32 %v463_v28, %v459_v25  ;;  %v466_v5 = vmul.f32 %v463_v28, %v460_v26 }
 0x14a   : > { %v467_v33 = vadd.f32 %v465_v31, %v448_v29  ;;  %v468_v63 = vadd.f32 %v466_v5, %v449_v30 }
 0x14c   : > { %v486_v35 = vadd.f32 %v484_v22, %v467_v33  ;;  %v487_v36 = vadd.f32 %v485_v32, %v468_v63 }
 0x14e   : > { %v494_v37 = vadd.f32 %v492_v34, %v486_v35  ;;  %v495_v38 = vadd.f32 %v492_v34, %v487_v36 }
 0x150   : > { %v496_v39 = vmax.f32 %v494_v37, 0.0  ;;  %v497_v40 = vmax.f32 %v495_v38, 0.0 }
 0x152   : > { %v502_v41 = vrot.slane %v496_v39, 4  ;;  %v503_v42 = vrot.slane %v497_v40, 4 }
 0x154   : > { %506 = vst [vmem:[%s717_s12] sm:$0xf0] %v502_v41 }
 0x155   : > { %507 = vst [vmem:[%s717_s12 + $0x8] sm:$0xf0] %v503_v42 }
 0x156 PF: > { %s16_s21 = sadd.s32 1, %s623_s21  }
 0x157   : > { %p13_p4 = scmp.ge.s32.totalorder %s16_s21, 4  }
 0x159   :  { %15 = sbr.rel (!%p13_p4) target bundleno = 1 (0x1), region = 74 }

</bundles_post_ra>
